<compile_context>
chip_gen: v7x
topology: tpu7x:2x2x1
jax: 0.10.0
libtpu: 0.0.40
codegen_flags: <defaults>
</compile_context>

<pallas_src>
import math
from functools import partial

import jax
import jax.numpy as jnp
from jax.experimental import pallas as pl
from jax.experimental.pallas import tpu as pltpu


# ----------------------------- hw-aware knobs --------------------------------

def _device_kind():
    try:
        return jax.devices()[0].device_kind.lower()
    except Exception:
        return ""


_KIND = _device_kind()
_IS_V7 = "v7" in _KIND

# Target input-block size.  v7x has ~2.3x the per-TC HBM BW of v6e, so larger
# blocks are needed to amortize the ~0.35us per-grid-step overhead; its VMEM is
# only 64 MiB, so keep the double-buffered footprint well below that.
_BLOCK_BYTES = (8 if _IS_V7 else 4) * 1024 * 1024
_VMEM_SAFE_FOOTPRINT = 40 * 1024 * 1024       # above this -> XLA fallback
_MIB = 1024 * 1024


def _vmem_limit(footprint_bytes):
    """Scoped-VMEM limit derived from the actual block footprint."""
    return int(min(max(footprint_bytes + 8 * _MIB, 32 * _MIB), 48 * _MIB))


def _sublane_unit(dtype):
    """Native sublane tile for the dtype: 8 (f32) / 16 (bf16) / 32 (int8)."""
    return max(8, 32 // jnp.dtype(dtype).itemsize)


def _pick_divisor(n, unit, cap, hard_unit=None):
    """Largest d with d | n, d <= cap and (d % unit == 0, or d % hard_unit == 0,
    or d == n).  A full dim is always a legal Pallas block dim; exact divisors
    keep every grid block fully in-bounds (no padding in the reduction)."""
    if n <= cap:
        return n
    units = [unit] if hard_unit is None or hard_unit == unit else [unit, hard_unit]
    for u in units:
        d = (cap // u) * u
        while d >= u:
            if n % d == 0:
                return d
            d -= u
    # TODO(synk): padded+masked tiling for awkward (prime-ish) dims; callers
    # guard the VMEM footprint of this full-dim fallback.
    return n


def _pick_flat_group(r, post, cap_elems):
    """Small-post path block width bg = post*g with g | r, bg <= cap and
    (bg % 128 == 0 or bg == r*post)."""
    W = r * post
    if W <= cap_elems:
        return W
    gmax = max(1, cap_elems // post)
    for g in range(gmax, 0, -1):
        if r % g == 0 and (post * g) % 128 == 0:
            return post * g
    return W  # full flat axis; caller guards VMEM footprint


# ----------------------------- kernels --------------------------------------


def _mean_mid_kernel_f32(x_ref, o_ref, *, inv_r):
    """Reduce axis 1 of a (bp, br, bq) block; accumulate directly in o_ref."""
    k = pl.program_id(2)

    @pl.when(k == 0)
    def _():
        o_ref[...] = jnp.zeros_like(o_ref)

    o_ref[...] += jnp.sum(x_ref[...], axis=1)

    @pl.when(k == pl.num_programs(2) - 1)
    def _():
        o_ref[...] = o_ref[...] * inv_r


def _mean_mid_kernel_acc(x_ref, o_ref, acc_ref, *, inv_r):
    """Same as above, with an f32 VMEM accumulator (non-f32 inputs)."""
    k = pl.program_id(2)

    @pl.when(k == 0)
    def _():
        acc_ref[...] = jnp.zeros_like(acc_ref)

    acc_ref[...] += jnp.sum(x_ref[...].astype(jnp.float32), axis=1)

    @pl.when(k == pl.num_programs(2) - 1)
    def _():
        o_ref[...] = (acc_ref[...] * inv_r).astype(o_ref.dtype)


def _mean_smallpost_kernel(x_ref, s_ref, o_ref, acc_ref, *, inv_r, post):
    """post < 128: lane-dense (bp, bg) blocks of the flat (r*post) axis;
    per-step segment-sum = one MXU matmul against a 0/1 selection matrix."""
    k = pl.program_id(1)

    @pl.when(k == 0)
    def _():
        acc_ref[...] = jnp.zeros_like(acc_ref)

    # MXU is an idle slot in this mem-bound kernel: the segment-sum is free and
    # keeps loads + accumulator fully lane-dense (acc is padded to 128 lanes).
    acc_ref[...] += jnp.dot(x_ref[...], s_ref[...],
                            preferred_element_type=jnp.float32)

    @pl.when(k == pl.num_programs(1) - 1)
    def _():
        o_ref[...] = (acc_ref[:, :post] * inv_r).astype(o_ref.dtype)


def _mean_last_kernel(x_ref, o_ref, acc_ref, *, inv_r):
    """Reduce the trailing (lane) axis.  Hot loop: lane-dense VPU adds into an
    (bp, 128) accumulator; the single XLU cross-lane reduce runs only once."""
    k = pl.program_id(1)

    @pl.when(k == 0)
    def _():
        acc_ref[...] = jnp.zeros_like(acc_ref)

    x = x_ref[...].astype(jnp.float32)
    br = x.shape[1]
    n_chunks = br // 128
    if br % 128 == 0 and n_chunks <= 64:
        part = x[:, 0:128]
        for c in range(1, n_chunks):
            part = part + x[:, c * 128:(c + 1) * 128]
        acc_ref[...] += part
    else:
        # br == full r and not 128-aligned (then there is a single reduce step
        # anyway), or an extreme chunk count: plain cross-lane reduce.
        acc_ref[:, 0:1] += jnp.sum(x, axis=-1, keepdims=True)

    @pl.when(k == pl.num_programs(1) - 1)
    def _():
        o_ref[...] = (jnp.sum(acc_ref[...], axis=-1, keepdims=True)
                      * inv_r).astype(o_ref.dtype)


def _sum_all_kernel(x_ref, o_ref, acc_ref):
    """Per-group partial sums for the global mean.  Hot loop: pure VPU adds
    into an (8, lanes) accumulator; the (8, lanes) slab is emitted once."""
    k = pl.program_id(1)

    @pl.when(k == 0)
    def _():
        acc_ref[...] = jnp.zeros_like(acc_ref)

    x = x_ref[...].astype(jnp.float32)
    rows, lanes = x.shape
    if rows % 8 == 0 and rows > 8:
        # Sublane-grouping reshape is tile-aligned (no relayout); axis-0 sum is
        # pure cross-vreg VPU adds.
        acc_ref[...] += jnp.sum(x.reshape(rows // 8, 8, lanes), axis=0)
    elif rows == 8:
        acc_ref[...] += x
    else:
        acc_ref[0:1, :] += jnp.sum(x, axis=0, keepdims=True)

    @pl.when(k == pl.num_programs(1) - 1)
    def _():
        o_ref[0] = acc_ref[...]


# ----------------------------- wrappers -------------------------------------


def _mean_middle_axis(x3, pre, r, post):
    """Mean over axis 1 of x3:(pre, r, post) -> (pre, post), post >= 128."""
    dtype = x3.dtype
    itemsize = jnp.dtype(dtype).itemsize
    sub = _sublane_unit(dtype)

    # Lane dim first: prefer the FULL trailing dim (contiguous br*post DMA runs
    # per row + unmasked lane-dense output stores); tile only when very wide.
    bq = post if post <= 2048 else _pick_divisor(post, 128, 2048)
    # Shrink bp before bq: bp does not affect DMA contiguity.
    bp_cap = 8 if post * itemsize >= 2048 else 64
    bp = _pick_divisor(pre, 8, max(8, bp_cap))
    # Reduce-axis chunk fills the per-step block-byte budget.
    budget = max(sub, _BLOCK_BYTES // (itemsize * bp * bq))
    br = _pick_divisor(r, sub, budget, hard_unit=8)

    in_bytes = bp * br * bq * itemsize
    out_bytes = bp * bq * max(itemsize, 4)
    footprint = 2 * in_bytes + 3 * out_bytes        # dbl-buf input, output+acc
    if footprint > _VMEM_SAFE_FOOTPRINT:
        # TODO(synk): padded+masked tiling for awkward dims instead of XLA.
        return jnp.mean(x3, axis=1).astype(dtype)

    grid = (pre // bp, post // bq, r // br)          # reduce axis last
    direct = dtype == jnp.float32
    kernel = _mean_mid_kernel_f32 if direct else _mean_mid_kernel_acc
    scratch = [] if direct else [pltpu.VMEM((bp, bq), jnp.float32)]

    in_spec_kwargs = {}
    if _IS_V7 and bq < post:
        # Strided, descriptor-heavy DMA on v7x: deepen the pipeline.
        in_spec_kwargs["pipeline_mode"] = pl.Buffered(3)

    return pl.pallas_call(
        partial(kernel, inv_r=1.0 / r),
        out_shape=jax.ShapeDtypeStruct((pre, post), dtype),
        grid=grid,
        in_specs=[pl.BlockSpec((bp, br, bq), lambda i, j, k: (i, k, j),
                               **in_spec_kwargs)],
        out_specs=pl.BlockSpec((bp, bq), lambda i, j, k: (i, j)),
        scratch_shapes=scratch,
        compiler_params=pltpu.CompilerParams(
            dimension_semantics=("parallel", "parallel", "arbitrary"),
            vmem_limit_bytes=_vmem_limit(footprint),
        ),
    )(x3)


def _mean_small_post(x3, pre, r, post):
    """Mean over axis 1 of x3:(pre, r, post) -> (pre, post), post < 128."""
    dtype = x3.dtype
    itemsize = jnp.dtype(dtype).itemsize
    sub = _sublane_unit(dtype)
    W = r * post
    x2 = x3.reshape(pre, W)                  # free reshape (row-major contig)

    bg = _pick_flat_group(r, post, cap_elems=2048)
    budget = max(sub, _BLOCK_BYTES // (itemsize * bg))
    bp = _pick_divisor(pre, sub, budget, hard_unit=8)

    sel_bytes = bg * 128 * itemsize
    in_bytes = bp * bg * itemsize
    out_bytes = bp * post * itemsize
    acc_bytes = bp * 128 * 4
    footprint = 2 * in_bytes + 2 * out_bytes + acc_bytes + 2 * sel_bytes
    if footprint > _VMEM_SAFE_FOOTPRINT:
        # TODO(synk): padded+masked tiling for awkward dims instead of XLA.
        return jnp.mean(x3, axis=1).astype(dtype)

    # 0/1 selection matrix: S[j, c] = 1 iff (j mod post) == c, padded to 128
    # lanes so the MXU result / accumulator stay lane-dense.  Its BlockSpec is
    # grid-invariant, so it stays resident in VMEM.
    j = jnp.arange(bg)[:, None] % post
    c = jnp.arange(128)[None, :]
    sel = (j == c).astype(dtype)

    grid = (pre // bp, W // bg)                      # reduce axis last
    return pl.pallas_call(
        partial(_mean_smallpost_kernel, inv_r=1.0 / r, post=post),
        out_shape=jax.ShapeDtypeStruct((pre, post), dtype),
        grid=grid,
        in_specs=[
            pl.BlockSpec((bp, bg), lambda i, k: (i, k)),
            pl.BlockSpec((bg, 128), lambda i, k: (0, 0)),
        ],
        out_specs=pl.BlockSpec((bp, post), lambda i, k: (i, 0)),
        scratch_shapes=[pltpu.VMEM((bp, 128), jnp.float32)],
        compiler_params=pltpu.CompilerParams(
            dimension_semantics=("parallel", "arbitrary"),
            vmem_limit_bytes=_vmem_limit(footprint),
        ),
    )(x2, sel)


def _mean_last_axis(x2, pre, r):
    """Mean over the trailing axis of x2:(pre, r) -> (pre, 1)."""
    dtype = x2.dtype
    itemsize = jnp.dtype(dtype).itemsize
    sub = _sublane_unit(dtype)

    br = _pick_divisor(r, 128, 4096)                 # full r when reasonable
    budget = max(sub, _BLOCK_BYTES // (itemsize * br))
    bp = _pick_divisor(pre, sub, budget, hard_unit=8)

    in_bytes = bp * br * itemsize
    acc_bytes = bp * 128 * 4
    out_bytes = bp * max(itemsize, 4)
    footprint = 2 * in_bytes + 2 * out_bytes + acc_bytes
    if footprint > _VMEM_SAFE_FOOTPRINT:
        # TODO(synk): padded+masked tiling for awkward dims instead of XLA.
        return jnp.mean(x2, axis=-1, keepdims=True).astype(dtype)

    grid = (pre // bp, r // br)                      # reduce axis last
    return pl.pallas_call(
        partial(_mean_last_kernel, inv_r=1.0 / r),
        out_shape=jax.ShapeDtypeStruct((pre, 1), dtype),
        grid=grid,
        in_specs=[pl.BlockSpec((bp, br), lambda i, k: (i, k))],
        out_specs=pl.BlockSpec((bp, 1), lambda i, k: (i, 0)),
        scratch_shapes=[pltpu.VMEM((bp, 128), jnp.float32)],
        compiler_params=pltpu.CompilerParams(
            dimension_semantics=("parallel", "arbitrary"),
            vmem_limit_bytes=_vmem_limit(footprint),
        ),
    )(x2)


def _mean_all(x):
    """Global mean over every element of x -> scalar (same dtype as x)."""
    dtype = x.dtype
    itemsize = jnp.dtype(dtype).itemsize
    sub = _sublane_unit(dtype)
    n = x.size

    lanes = _pick_divisor(n, 128, 512)               # flat 2-D view lane width
    rows = n // lanes
    budget = max(sub, _BLOCK_BYTES // (itemsize * lanes))
    brow = _pick_divisor(rows, sub, budget, hard_unit=8)
    steps = rows // brow

    # Leading "parallel" group axis: on v7x both TensorCores get a share.
    groups = 1
    for cand in (8, 4, 2):
        if steps % cand == 0:
            groups = cand
            break
    steps_per_group = steps // groups

    in_bytes = brow * lanes * itemsize
    acc_bytes = 8 * lanes * 4
    out_bytes = 8 * lanes * 4
    footprint = 2 * in_bytes + 2 * out_bytes + acc_bytes
    if footprint > _VMEM_SAFE_FOOTPRINT:
        # TODO(synk): padded+masked tiling for awkward sizes instead of XLA.
        return jnp.mean(x)

    x2 = x.reshape(rows, lanes)                      # free reshape (flat array)
    partial_sums = pl.pallas_call(
        _sum_all_kernel,
        out_shape=jax.ShapeDtypeStruct((groups, 8, lanes), jnp.float32),
        grid=(groups, steps_per_group),
        in_specs=[pl.BlockSpec((brow, lanes),
                               lambda g, k: (g * steps_per_group + k, 0))],
        out_specs=pl.BlockSpec((1, 8, lanes), lambda g, k: (g, 0, 0)),
        scratch_shapes=[pltpu.VMEM((8, lanes), jnp.float32)],
        compiler_params=pltpu.CompilerParams(
            dimension_semantics=("parallel", "arbitrary"),
            vmem_limit_bytes=_vmem_limit(footprint),
        ),
    )(x2)
    # Tiny final reduction of the per-group partial sums outside the kernel.
    return (jnp.sum(partial_sums) * (1.0 / n)).astype(dtype)


# ----------------------------- public API -----------------------------------


def pallas_mean(x, dim=None):
    """Equivalent of torch.mean(x, dim=dim); dim may be None (global mean)."""
    if not jnp.issubdtype(x.dtype, jnp.floating):
        # torch.mean raises for integer dtypes; follow jnp.mean and promote.
        x = x.astype(jnp.float32)

    if dim is None:
        return _mean_all(x)

    dim = dim % x.ndim
    shape = x.shape
    pre = 1
    for s in shape[:dim]:
        pre *= s
    r = shape[dim]
    post = 1
    for s in shape[dim + 1:]:
        post *= s
    out_shape = shape[:dim] + shape[dim + 1:]

    if r == 1:
        return x.reshape(out_shape)                  # degenerate reduction
    if post == 1:
        out = _mean_last_axis(x.reshape(pre, r), pre, r)
    elif post < 128:
        out = _mean_small_post(x.reshape(pre, r, post), pre, r, post)
    else:
        out = _mean_middle_axis(x.reshape(pre, r, post), pre, r, post)
    return out.reshape(out_shape)


class Mean:
    """Pallas analogue of the PyTorch Mean module."""

    def __init__(self, dim=None):
        self.dim = dim

    def __call__(self, x):
        return pallas_mean(x, self.dim)


if __name__ == "__main__":
    key = jax.random.PRNGKey(0)
    x = jax.random.normal(key, (2, 4, 16, 16), dtype=jnp.float32)

    # dim=1 (channel mean): middle-axis path, full-post lane-dense blocks.
    y1 = Mean(dim=1)(x)
    jax.block_until_ready(y1)
    r1 = jnp.mean(x, axis=1)
    assert y1.shape == r1.shape == (2, 16, 16)
    assert jnp.allclose(y1, r1, atol=1e-5, rtol=1e-5)

    # dim=2: small-post (post=16 < 128) MXU segment-sum path.
    y2 = Mean(dim=2)(x)
    jax.block_until_ready(y2)
    r2 = jnp.mean(x, axis=2)
    assert y2.shape == r2.shape == (2, 4, 16)
    assert jnp.allclose(y2, r2, atol=1e-5, rtol=1e-5)

    # dim=3: last-axis path with lane-dense accumulator.
    y3 = Mean(dim=3)(x)
    jax.block_until_ready(y3)
    r3 = jnp.mean(x, axis=3)
    assert y3.shape == r3.shape == (2, 4, 16)
    assert jnp.allclose(y3, r3, atol=1e-5, rtol=1e-5)

    # dim=None: global mean with a parallel group axis.
    yg = Mean(dim=None)(x)
    jax.block_until_ready(yg)
    rg = jnp.mean(x)
    assert yg.shape == ()
    assert jnp.allclose(yg, rg, atol=1e-5, rtol=1e-5)

    print("KERNEL_OK")
</pallas_src>

<mosaic_0001>
module attributes {stable_mosaic.version = 11 : i64} {
  func.func @_mean_mid_kernel_f32(%arg0: i32, %arg1: i32, %arg2: i32, %arg3: memref<2x4x256xf32, #tpu.memory_space<vmem>>, %arg4: memref<2x256xf32, #tpu.memory_space<vmem>>) attributes {dimension_semantics = [#tpu.dimension_semantics<parallel>, #tpu.dimension_semantics<parallel>, #tpu.dimension_semantics<arbitrary>], iteration_bounds = array<i64: 1, 1, 1>, scalar_prefetch = 0 : i64, scratch_operands = 0 : i64, tpu.core_type = #tpu.core_type<tc>, window_params = [{transform_indices = @transform_0, window_bounds = array<i64: 2, 4, 256>}, {transform_indices = @transform_1, window_bounds = array<i64: 2, 256>}]} {
    %c0_i32 = arith.constant 0 : i32
    %0 = arith.cmpi eq, %arg2, %c0_i32 : i32
    %1 = arith.extui %0 : i1 to i32
    %c0_i32_0 = arith.constant 0 : i32
    %2 = arith.cmpi ne, %1, %c0_i32_0 : i32
    scf.if %2 {
      %cst_9 = arith.constant 0.000000e+00 : f32
      %11 = vector.broadcast %cst_9 : f32 to vector<2x256xf32>
      %c0_10 = arith.constant 0 : index
      %c0_11 = arith.constant 0 : index
      %12 = vector.load %arg4[%c0_10, %c0_11] : memref<2x256xf32, #tpu.memory_space<vmem>>, vector<2x256xf32>
      tpu.vector_store %arg4[%c0_10, %c0_11], %11 {strides = array<i32>} : memref<2x256xf32, #tpu.memory_space<vmem>>, vector<2x256xf32>,
    } else {
    }
    %c0 = arith.constant 0 : index
    %c0_1 = arith.constant 0 : index
    %3 = vector.load %arg4[%c0, %c0_1] : memref<2x256xf32, #tpu.memory_space<vmem>>, vector<2x256xf32>
    %c0_2 = arith.constant 0 : index
    %c0_3 = arith.constant 0 : index
    %c0_4 = arith.constant 0 : index
    %4 = vector.load %arg3[%c0_2, %c0_3, %c0_4] : memref<2x4x256xf32, #tpu.memory_space<vmem>>, vector<2x4x256xf32>
    %cst = arith.constant dense<0.000000e+00> : vector<2x256xf32>
    %5 = vector.multi_reduction <add>, %4, %cst [1] : vector<2x4x256xf32> to vector<2x256xf32>
    %6 = arith.addf %3, %5 : vector<2x256xf32>
    %c0_5 = arith.constant 0 : index
    %c0_6 = arith.constant 0 : index
    %7 = vector.load %arg4[%c0_5, %c0_6] : memref<2x256xf32, #tpu.memory_space<vmem>>, vector<2x256xf32>
    tpu.vector_store %arg4[%c0_5, %c0_6], %6 {strides = array<i32>} : memref<2x256xf32, #tpu.memory_space<vmem>>, vector<2x256xf32>,
    %c0_i32_7 = arith.constant 0 : i32
    %8 = arith.cmpi eq, %arg2, %c0_i32_7 : i32
    %9 = arith.extui %8 : i1 to i32
    %c0_i32_8 = arith.constant 0 : i32
    %10 = arith.cmpi ne, %9, %c0_i32_8 : i32
    scf.if %10 {
      %c0_9 = arith.constant 0 : index
      %c0_10 = arith.constant 0 : index
      %11 = vector.load %arg4[%c0_9, %c0_10] : memref<2x256xf32, #tpu.memory_space<vmem>>, vector<2x256xf32>
      %cst_11 = arith.constant 2.500000e-01 : f32
      %12 = vector.broadcast %cst_11 : f32 to vector<2x256xf32>
      %13 = arith.mulf %11, %12 : vector<2x256xf32>
      %c0_12 = arith.constant 0 : index
      %c0_13 = arith.constant 0 : index
      %14 = vector.load %arg4[%c0_12, %c0_13] : memref<2x256xf32, #tpu.memory_space<vmem>>, vector<2x256xf32>
      tpu.vector_store %arg4[%c0_12, %c0_13], %13 {strides = array<i32>} : memref<2x256xf32, #tpu.memory_space<vmem>>, vector<2x256xf32>,
    } else {
    }
    return
  }
  func.func @transform_0(%arg0: i32, %arg1: i32, %arg2: i32) -> (i32, i32, i32) {
    %c0_i32 = arith.constant 0 : i32
    return %arg0, %arg2, %arg1 : i32, i32, i32
  }
  func.func @transform_1(%arg0: i32, %arg1: i32, %arg2: i32) -> (i32, i32) {
    %c0_i32 = arith.constant 0 : i32
    return %arg0, %arg1 : i32, i32
  }
}

</mosaic_0001>

<bundles_post_ra>
// kernel: tpu_custom_call.1
= control target key start
LH: loop header
LB: loop body
LE: loop exit
PB: predicated region body
PF: predicated region fallthrough
CT: control target
= control target key end

     0   :  { %6 = vsyncpa [#allocation3], 0  ;;  %s219_s0 = inlined_call_operand.hbm [shape: f32[2,4,256], index: 0, kind: input, shape index: {}]   ;;  %s220_s1 = inlined_call_operand.hbm [shape: f32[2,256], index: 1, kind: output, shape index: {}]  }
   0x1   :  { %7 = vsyncpa [#allocation4], 0  ;;  %s179_s6 = smov [#allocation2]   ;;  %s131_s10 = scalar_lea.hbm %s219_s0, 256 }
   0x2   :  { %s13_s7 = sshll.u32 %s179_s6, 4  ;;  %p132_p0 = scmp.ne.s32.totalorder %s219_s0, %s131_s10  ;;  %s14_s7 = int_to_ptr.vmem [resolvable:$true] %s13_s7 }
   0x3   :  { %p135_p1 = scmp.lt.u32.totalorder %s131_s10, %s219_s0 }
   0x5   :  { %p137_p2 = pnand %p135_p1, %p132_p0 }
   0x7   :  { %140 = shalt.err (!%p137_p2)
}
   0x8   :  { %s141_s15 = scalar_lea.vmem %s14_s7, 256  ;;  %p146_p4 = scmp.lt.s32.totalorder %s14_s7, %s14_s7 }
   0x9   :  { %p142_p3 = scmp.ne.s32.totalorder %s14_s7, %s141_s15  ;;  %p147_p5 = scmp.lt.s32.totalorder %s141_s15, %s141_s15 }
   0xb   :  { %p148_p6 = por %p147_p5, %p146_p4 }
   0xd   :  { %p149_p7 = pnand %p148_p6, %p142_p3 }
   0xf   :  { %152 = shalt.err (!%p149_p7)
}
  0x10   :  { %s180_s16 = smov 128   ;;  %s181_s17 = smov 8  }
  0x11   :  { %19 = dma.hbm_to_vmem [thread:$0]  %s219_s0, 256, %s14_s7, [#allocation3], %s180_s16, %s180_s16, %s181_s17  }
  0x12   :  { %175 = dma.done.wait [#allocation3], 256  }
  0x13   :  { %176 = vsyncadd [#allocation3], 4294967040  ;;  %v182_v0 = vmov 0.0   ;;  %vm37_vm0 = vcmask 1043456   ;;  %v29_v1 = vld [vmem:[#allocation2] sm:$0xff]  ;;  %v30_v2 = vld [vmem:[#allocation2 + $0x8] sm:$0xff]  ;;  %v74_v17 = vlaneseq }
  0x14   :  { %27 = vst [vmem:[#allocation5] sm:$0xf] %v182_v0  ;;  %v33_v3 = vcombine.high %v29_v1, %v29_v1  ;;  %v34_v4 = vcombine.high %v30_v2, %v30_v2  ;;  %v38_v5 = vsel %vm37_vm0, %v29_v1, 0.0  ;;  %v52_v6 = vsel %vm37_vm0, %v30_v2, 0.0  ;;  %s184_s0 = smov [#allocation5]  }
  0x15   :  { %v39_v7 = vrot.slane %v38_v5, 4  ;;  %v53_v8 = vrot.slane %v52_v6, 4  ;;  %v183_v15 = vmov 1983009808   ;;  %v75_v27 = vshrl.u32 %v74_v17, 7  ;;  %s114_s20 = sshll.u32 %s184_s0, 4  ;;  %s115_s20 = int_to_ptr.vmem [resolvable:$true] %s114_s20 }
  0x16   :  { %v45_v9 = vsel %vm37_vm0, %v33_v3, 0.0  ;;  %v59_v10 = vsel %vm37_vm0, %v34_v4, 0.0  ;;  %v72_v16 = vunpack.c.l.s4 %v183_v15  ;;  %vm91_vm1 = vcmask 1041409   ;;  %s153_s21 = scalar_lea.vmem %s115_s20, 64  ;;  %p158_p9 = scmp.lt.s32.totalorder %s115_s20, %s115_s20 }
  0x17   :  { %v40_v11 = vadd.f32 %v39_v7, %v38_v5  ;;  %v46_v12 = vrot.slane %v45_v9, 4  ;;  %v54_v13 = vadd.f32 %v53_v8, %v52_v6  ;;  %v60_v14 = vrot.slane %v59_v10, 4  ;;  %p154_p8 = scmp.ne.s32.totalorder %s115_s20, %s153_s21  ;;  %p159_p10 = scmp.lt.s32.totalorder %s153_s21, %s153_s21 }
  0x18   :  { %v73_v26 = vunpack.c.0.s8 %v72_v16  ;;  %vm93_vm2 = vcmask 1043459   ;;  %vm95_vm3 = vcmask 1045509   ;;  %vm97_vm4 = vcmask 1047559  }
  0x19   :  { %v41_v18 = vrot.slane %v40_v11, 2  ;;  %v47_v19 = vadd.f32 %v46_v12, %v45_v9  ;;  %v55_v20 = vrot.slane %v54_v13, 2  ;;  %v61_v21 = vadd.f32 %v60_v14, %v59_v10  ;;  %p160_p11 = por %p159_p10, %p158_p9 }
  0x1a   :  { %v76_v38 = vsub.s32 %v73_v26, %v75_v27 }
  0x1b   :  { %v42_v22 = vadd.f32 %v41_v18, %v40_v11  ;;  %v48_v23 = vrot.slane %v47_v19, 2  ;;  %v56_v24 = vadd.f32 %v55_v20, %v54_v13  ;;  %v62_v25 = vrot.slane %v61_v21, 2  ;;  %v28_v45 = vld [vmem:[#allocation5] sm:$0xf]  ;;  %p161_p12 = pnand %p160_p11, %p154_p8 }
  0x1d   :  { %v43_v28 = vrot.slane %v42_v22, 1  ;;  %v49_v29 = vadd.f32 %v48_v23, %v47_v19  ;;  %v57_v30 = vrot.slane %v56_v24, 1  ;;  %v63_v31 = vadd.f32 %v62_v25, %v61_v21 }
  0x1f   :  { %v44_v32 = vadd.f32 %v43_v28, %v42_v22  ;;  %v50_v33 = vrot.slane %v49_v29, 1  ;;  %v58_v34 = vadd.f32 %v57_v30, %v56_v24  ;;  %v64_v35 = vrot.slane %v63_v31, 1 }
  0x21   :  { %v51_v36 = vadd.f32 %v50_v33, %v49_v29  ;;  %v65_v37 = vadd.f32 %v64_v35, %v63_v31 }
  0x23   :  { %v70_v39 = vcombine.low %v44_v32, %v51_v36  ;;  %v78_v40 = vcombine.low %v58_v34, %v65_v37 }
  0x25   :  { %v77_v41 = vrot.slane %v70_v39, %v76_v38  ;;  %v85_v42 = vrot.slane %v78_v40, %v76_v38 }
  0x27   :  { %v90_v43 = vrot.slane %v85_v42, 7 }
  0x29   :  { %v92_v44 = vsel %vm91_vm1, %v90_v43, %v77_v41 }
  0x2a   :  { %v94_v46 = vsel %vm93_vm2, %v90_v43, %v92_v44 }
  0x2b   :  { %v96_v47 = vsel %vm95_vm3, %v90_v43, %v94_v46 }
  0x2c   :  { %v98_v48 = vsel %vm97_vm4, %v90_v43, %v96_v47 }
  0x2d   :  { %v100_v49 = vadd.f32 %v98_v48, %v28_v45 }
  0x2f   :  { %101 = vst [vmem:[#allocation5] sm:$0xf] %v100_v49 }
  0x36   :  { %v105_v50 = vld [vmem:[#allocation5] sm:$0xf] }
  0x37   :  { %v106_v51 = vmul.f32 0.25, %v105_v50 }
  0x39   :  { %107 = vst [vmem:[#allocation5] sm:$0xf] %v106_v51 }
  0x3a   :  { %164 = shalt.err (!%p161_p12)
}
  0x3b   :  { %s165_s24 = scalar_lea.hbm %s220_s1, 64 }
  0x3c   :  { %p166_p13 = scmp.ne.s32.totalorder %s220_s1, %s165_s24  ;;  %p169_p0 = scmp.lt.u32.totalorder %s165_s24, %s220_s1 }
  0x3e   :  { %p171_p1 = pnand %p169_p0, %p166_p13 }
  0x40   :  { %174 = shalt.err (!%p171_p1)
}
  0x41   :  { %117 = dma.vmem_to_hbm [thread:$0]  %s115_s20, 64, %s220_s1, [#allocation4]  }
  0x42   :  { %177 = dma.done.wait [#allocation4], 64  }
  0x43   :  { %178 = vsyncadd [#allocation4], 4294967232 }
  0x44   :  { %121 = vsyncpa [#allocation3], 1 }
  0x45   :  { %122 = vsyncpa [#allocation4], 1 }

</bundles_post_ra>
